<compile_context>
chip_gen: v7x
topology: tpu7x:2x2x1
jax: 0.10.0
libtpu: 0.0.40
codegen_flags: <defaults>
</compile_context>

<pallas_src>
import functools

import jax
import jax.numpy as jnp
from jax import lax
from jax.experimental import pallas as pl
from jax.experimental.pallas import tpu as pltpu

EPS = 1e-5
LANE = 128


def _round_up(x, m):
    return (x + m - 1) // m * m


# ----------------------------------------------------------------------------
# Pallas kernel: fused-im2col 3x3 "same" conv + folded-BN shift + ReLU
# ----------------------------------------------------------------------------
def _conv3x3_bn_relu_kernel(x_ref, w_ref, shift_ref, o_ref, *, pad_output):
    # x_ref: (1, Ho+2, Wo+2, Cin) spatially pre-padded input slab (VMEM)
    # w_ref: (9*Cin, Cp) GEMM weight, BN scale folded in, Cp multiple of 128
    # shift_ref: (1, Cp) f32 folded-BN shift
    xp = x_ref[0]
    Hp, Wp, Cin = xp.shape
    Ho, Wo = Hp - 2, Wp - 2
    Cp = o_ref.shape[-1]

    # Fused im2col: accumulate the nine shifted taps' GEMMs in f32.  The
    # (Ho*Wo, 9*Cin) patch matrix is never materialized (not in HBM, not in
    # VMEM).  Weight rows are laid out (dy, dx, ci)-major, matching the taps.
    acc = jnp.zeros((Ho * Wo, Cp), jnp.float32)
    for dy in range(3):
        for dx in range(3):
            tap = xp[dy:dy + Ho, dx:dx + Wo, :].reshape(Ho * Wo, Cin)
            w_tap = w_ref[(3 * dy + dx) * Cin:(3 * dy + dx + 1) * Cin, :]
            acc += jnp.dot(tap, w_tap, preferred_element_type=jnp.float32)

    y = jnp.maximum(acc + shift_ref[...], 0.0)        # folded BN shift + ReLU (f32)
    y = y.reshape(Ho, Wo, Cp).astype(o_ref.dtype)

    if pad_output:
        # Zero spatial border so the next conv can consume this block directly
        # as its pre-padded input.
        o_ref[...] = jnp.zeros_like(o_ref)
        o_ref[0, 1:Ho + 1, 1:Wo + 1, :] = y
    else:
        o_ref[0] = y


def conv3x3_bn_relu(x_padded_nhwc, w_gemm, shift, *, pad_output, out_dtype):
    """x_padded_nhwc: (N, Ho+2, Wo+2, Cin) spatially zero-padded activation.
    Returns (N, Ho+2, Wo+2, Cp) if pad_output else (N, Ho, Wo, Cp)."""
    N, Hp, Wp, Cin = x_padded_nhwc.shape
    Ho, Wo = Hp - 2, Wp - 2
    K, Cp = w_gemm.shape
    assert K == 9 * Cin, (K, Cin)
    out_spatial = (Hp, Wp) if pad_output else (Ho, Wo)

    kernel = functools.partial(_conv3x3_bn_relu_kernel, pad_output=pad_output)
    return pl.pallas_call(
        kernel,
        out_shape=jax.ShapeDtypeStruct((N,) + out_spatial + (Cp,), out_dtype),
        grid=(N,),
        in_specs=[
            pl.BlockSpec((1, Hp, Wp, Cin), lambda n: (n, 0, 0, 0)),
            pl.BlockSpec((K, Cp), lambda n: (0, 0)),
            pl.BlockSpec((1, Cp), lambda n: (0, 0)),
        ],
        out_specs=pl.BlockSpec((1,) + out_spatial + (Cp,), lambda n: (n, 0, 0, 0)),
        compiler_params=pltpu.CompilerParams(
            dimension_semantics=("parallel",),   # batch axis -> 2 TCs on v7x
        ),
    )(x_padded_nhwc, w_gemm, shift)


# ----------------------------------------------------------------------------
# Parameter preparation (one-time wrapper ops on parameters)
# ----------------------------------------------------------------------------
def _fold_bn(gamma, beta, mean, var):
    scale = gamma / jnp.sqrt(var + EPS)
    shift = beta - mean * scale
    return scale, shift


def _prep_conv(w_oihw, gamma, beta, mean, var, cin_pad, compute_dtype):
    """(Cout,Cin,3,3) conv weight + eval-mode BN -> GEMM weight with the BN
    scale folded in, zero-padded to (9*cin_pad, cout_pad), and f32 shift."""
    Cout, Cin, _, _ = w_oihw.shape
    cout_pad = _round_up(Cout, LANE)
    scale, shift = _fold_bn(gamma.astype(jnp.float32), beta.astype(jnp.float32),
                            mean.astype(jnp.float32), var.astype(jnp.float32))
    w = jnp.transpose(w_oihw, (2, 3, 1, 0)).astype(jnp.float32)   # (3,3,Cin,Cout)
    w = w * scale[None, None, None, :]                            # fold BN scale
    w = jnp.pad(w, ((0, 0), (0, 0), (0, cin_pad - Cin), (0, cout_pad - Cout)))
    w = w.reshape(9 * cin_pad, cout_pad).astype(compute_dtype)
    shift = jnp.pad(shift, (0, cout_pad - Cout)).reshape(1, cout_pad)
    return w, shift, cout_pad


def init_down_params(key, in_channels, out_channels, dtype=jnp.float32):
    mid = out_channels  # DoubleConv: mid_channels defaults to out_channels
    ks = jax.random.split(key, 10)
    return {
        "w1": jax.random.normal(ks[0], (mid, in_channels, 3, 3), dtype) * 0.1,
        "w2": jax.random.normal(ks[1], (out_channels, mid, 3, 3), dtype) * 0.1,
        "g1": 1.0 + 0.1 * jax.random.normal(ks[2], (mid,), dtype),
        "b1": 0.1 * jax.random.normal(ks[3], (mid,), dtype),
        "m1": 0.1 * jax.random.normal(ks[4], (mid,), dtype),
        "v1": 1.0 + 0.1 * jnp.abs(jax.random.normal(ks[5], (mid,), dtype)),
        "g2": 1.0 + 0.1 * jax.random.normal(ks[6], (out_channels,), dtype),
        "b2": 0.1 * jax.random.normal(ks[7], (out_channels,), dtype),
        "m2": 0.1 * jax.random.normal(ks[8], (out_channels,), dtype),
        "v2": 1.0 + 0.1 * jnp.abs(jax.random.normal(ks[9], (out_channels,), dtype)),
    }


# ----------------------------------------------------------------------------
# Down forward pass
# ----------------------------------------------------------------------------
def down_forward(x_nchw, params, *, compute_dtype=jnp.float32):
    """Down.forward: MaxPool2d(2) -> (conv3x3 + BN + ReLU) x 2 (eval-mode BN)."""
    N, Cin, H, W = x_nchw.shape
    H2, W2 = H // 2, W // 2            # floor, matching nn.MaxPool2d(2)
    cout = params["w2"].shape[0]

    w1, sh1, mid_pad = _prep_conv(params["w1"], params["g1"], params["b1"],
                                  params["m1"], params["v1"], Cin, compute_dtype)
    w2, sh2, _ = _prep_conv(params["w2"], params["g2"], params["b2"],
                            params["m2"], params["v2"], mid_pad, compute_dtype)

    # Glue (XLA fuses into one pass over x): NCHW->NHWC, 2x2 max pool as
    # elementwise maxes of strided views, then the first conv's zero padding.
    x = jnp.transpose(x_nchw, (0, 2, 3, 1))[:, :2 * H2, :2 * W2, :]
    x = jnp.maximum(
        jnp.maximum(x[:, 0::2, 0::2, :], x[:, 0::2, 1::2, :]),
        jnp.maximum(x[:, 1::2, 0::2, :], x[:, 1::2, 1::2, :]),
    )
    x = jnp.pad(x, ((0, 0), (1, 1), (1, 1), (0, 0))).astype(compute_dtype)

    x = conv3x3_bn_relu(x, w1, sh1, pad_output=True, out_dtype=compute_dtype)
    x = conv3x3_bn_relu(x, w2, sh2, pad_output=False, out_dtype=compute_dtype)

    x = x[..., :cout].astype(x_nchw.dtype)           # drop channel lane-padding
    return jnp.transpose(x, (0, 3, 1, 2))            # NHWC -> NCHW


# ----------------------------------------------------------------------------
# Pure-JAX reference (correctness check)
# ----------------------------------------------------------------------------
def down_forward_ref(x_nchw, params):
    x = lax.reduce_window(x_nchw, -jnp.inf, lax.max,
                          (1, 1, 2, 2), (1, 1, 2, 2), "VALID")

    def conv_bn_relu(x, w, g, b, m, v):
        y = lax.conv_general_dilated(x, w, (1, 1), "SAME",
                                     dimension_numbers=("NCHW", "OIHW", "NCHW"))
        s = g / jnp.sqrt(v + EPS)
        y = y * s[None, :, None, None] + (b - m * s)[None, :, None, None]
        return jnp.maximum(y, 0.0)

    x = conv_bn_relu(x, params["w1"], params["g1"], params["b1"], params["m1"], params["v1"])
    x = conv_bn_relu(x, params["w2"], params["g2"], params["b2"], params["m2"], params["v2"])
    return x


if __name__ == "__main__":
    key = jax.random.PRNGKey(0)
    k_x, k_p = jax.random.split(key)

    N, C_in, C_out, H, W = 2, 4, 8, 16, 16
    x = jax.random.normal(k_x, (N, C_in, H, W), jnp.float32)
    params = init_down_params(k_p, C_in, C_out)

    ref = jax.block_until_ready(down_forward_ref(x, params))

    # f32 path: tight check against the pure-JAX reference.
    out = jax.block_until_ready(down_forward(x, params, compute_dtype=jnp.float32))
    assert out.shape == (N, C_out, H // 2, W // 2), out.shape
    assert jnp.allclose(out, ref, atol=1e-4, rtol=1e-4), \
        f"f32 max abs err {float(jnp.max(jnp.abs(out - ref)))}"

    # bf16 MXU path (f32 accumulation + f32 BN/ReLU epilogue): loose check.
    out_bf16 = jax.block_until_ready(
        down_forward(x, params, compute_dtype=jnp.bfloat16))
    assert out_bf16.shape == out.shape
    assert jnp.allclose(out_bf16, ref, atol=1e-1, rtol=1e-1), \
        f"bf16 max abs err {float(jnp.max(jnp.abs(out_bf16 - ref)))}"

    print("KERNEL_OK")
</pallas_src>

<mosaic_0001>
module attributes {stable_mosaic.version = 11 : i64} {
  func.func @_conv3x3_bn_relu_kernel(%arg0: i32, %arg1: memref<1x10x10x4xf32, #tpu.memory_space<vmem>>, %arg2: memref<36x128xf32, #tpu.memory_space<vmem>>, %arg3: memref<1x128xf32, #tpu.memory_space<vmem>>, %arg4: memref<1x10x10x128xf32, #tpu.memory_space<vmem>>) attributes {dimension_semantics = [#tpu.dimension_semantics<parallel>], iteration_bounds = array<i64: 2>, scalar_prefetch = 0 : i64, scratch_operands = 0 : i64, tpu.core_type = #tpu.core_type<tc>, window_params = [{transform_indices = @transform_0, window_bounds = array<i64: 1, 10, 10, 4>}, {pipeline_mode = #tpu.pipeline_mode<synchronous>, transform_indices = @transform_1, window_bounds = array<i64: 36, 128>}, {pipeline_mode = #tpu.pipeline_mode<synchronous>, transform_indices = @transform_2, window_bounds = array<i64: 1, 128>}, {transform_indices = @transform_3, window_bounds = array<i64: 1, 10, 10, 128>}]} {
    %c0 = arith.constant 0 : index
    %c0_0 = arith.constant 0 : index
    %c0_1 = arith.constant 0 : index
    %c0_2 = arith.constant 0 : index
    %0 = vector.load %arg1[%c0, %c0_0, %c0_1, %c0_2] : memref<1x10x10x4xf32, #tpu.memory_space<vmem>>, vector<1x10x10x4xf32>
    %1 = vector.shape_cast %0 : vector<1x10x10x4xf32> to vector<10x10x4xf32>
    %cst = arith.constant 0.000000e+00 : f32
    %2 = vector.broadcast %cst : f32 to vector<64x128xf32>
    %3 = vector.extract_strided_slice %1 {offsets = [0, 0, 0], sizes = [8, 8, 4], strides = [1, 1, 1]} : vector<10x10x4xf32> to vector<8x8x4xf32>
    %4 = vector.shape_cast %3 : vector<8x8x4xf32> to vector<64x4xf32>
    %c0_3 = arith.constant 0 : index
    %c0_4 = arith.constant 0 : index
    %5 = vector.load %arg2[%c0_3, %c0_4] : memref<36x128xf32, #tpu.memory_space<vmem>>, vector<4x128xf32>
    %cst_5 = arith.constant dense<0.000000e+00> : vector<64x128xf32>
    %6 = tpu.matmul %4, %5, %cst_5 {dimension_numbers = #tpu.dot_dimension_numbers<[1], [0], [0], [1], [0, 0, 1, 1], [], []>} : vector<64x4xf32>, vector<4x128xf32>, vector<64x128xf32> -> vector<64x128xf32>
    %7 = arith.addf %2, %6 : vector<64x128xf32>
    %8 = vector.extract_strided_slice %1 {offsets = [0, 1, 0], sizes = [8, 8, 4], strides = [1, 1, 1]} : vector<10x10x4xf32> to vector<8x8x4xf32>
    %9 = vector.shape_cast %8 : vector<8x8x4xf32> to vector<64x4xf32>
    %c4 = arith.constant 4 : index
    %c0_6 = arith.constant 0 : index
    %10 = vector.load %arg2[%c4, %c0_6] : memref<36x128xf32, #tpu.memory_space<vmem>>, vector<4x128xf32>
    %cst_7 = arith.constant dense<0.000000e+00> : vector<64x128xf32>
    %11 = tpu.matmul %9, %10, %cst_7 {dimension_numbers = #tpu.dot_dimension_numbers<[1], [0], [0], [1], [0, 0, 1, 1], [], []>} : vector<64x4xf32>, vector<4x128xf32>, vector<64x128xf32> -> vector<64x128xf32>
    %12 = arith.addf %7, %11 : vector<64x128xf32>
    %13 = vector.extract_strided_slice %1 {offsets = [0, 2, 0], sizes = [8, 8, 4], strides = [1, 1, 1]} : vector<10x10x4xf32> to vector<8x8x4xf32>
    %14 = vector.shape_cast %13 : vector<8x8x4xf32> to vector<64x4xf32>
    %c8 = arith.constant 8 : index
    %c0_8 = arith.constant 0 : index
    %15 = vector.load %arg2[%c8, %c0_8] : memref<36x128xf32, #tpu.memory_space<vmem>>, vector<4x128xf32>
    %cst_9 = arith.constant dense<0.000000e+00> : vector<64x128xf32>
    %16 = tpu.matmul %14, %15, %cst_9 {dimension_numbers = #tpu.dot_dimension_numbers<[1], [0], [0], [1], [0, 0, 1, 1], [], []>} : vector<64x4xf32>, vector<4x128xf32>, vector<64x128xf32> -> vector<64x128xf32>
    %17 = arith.addf %12, %16 : vector<64x128xf32>
    %18 = vector.extract_strided_slice %1 {offsets = [1, 0, 0], sizes = [8, 8, 4], strides = [1, 1, 1]} : vector<10x10x4xf32> to vector<8x8x4xf32>
    %19 = vector.shape_cast %18 : vector<8x8x4xf32> to vector<64x4xf32>
    %c12 = arith.constant 12 : index
    %c0_10 = arith.constant 0 : index
    %20 = vector.load %arg2[%c12, %c0_10] : memref<36x128xf32, #tpu.memory_space<vmem>>, vector<4x128xf32>
    %cst_11 = arith.constant dense<0.000000e+00> : vector<64x128xf32>
    %21 = tpu.matmul %19, %20, %cst_11 {dimension_numbers = #tpu.dot_dimension_numbers<[1], [0], [0], [1], [0, 0, 1, 1], [], []>} : vector<64x4xf32>, vector<4x128xf32>, vector<64x128xf32> -> vector<64x128xf32>
    %22 = arith.addf %17, %21 : vector<64x128xf32>
    %23 = vector.extract_strided_slice %1 {offsets = [1, 1, 0], sizes = [8, 8, 4], strides = [1, 1, 1]} : vector<10x10x4xf32> to vector<8x8x4xf32>
    %24 = vector.shape_cast %23 : vector<8x8x4xf32> to vector<64x4xf32>
    %c16 = arith.constant 16 : index
    %c0_12 = arith.constant 0 : index
    %25 = vector.load %arg2[%c16, %c0_12] : memref<36x128xf32, #tpu.memory_space<vmem>>, vector<4x128xf32>
    %cst_13 = arith.constant dense<0.000000e+00> : vector<64x128xf32>
    %26 = tpu.matmul %24, %25, %cst_13 {dimension_numbers = #tpu.dot_dimension_numbers<[1], [0], [0], [1], [0, 0, 1, 1], [], []>} : vector<64x4xf32>, vector<4x128xf32>, vector<64x128xf32> -> vector<64x128xf32>
    %27 = arith.addf %22, %26 : vector<64x128xf32>
    %28 = vector.extract_strided_slice %1 {offsets = [1, 2, 0], sizes = [8, 8, 4], strides = [1, 1, 1]} : vector<10x10x4xf32> to vector<8x8x4xf32>
    %29 = vector.shape_cast %28 : vector<8x8x4xf32> to vector<64x4xf32>
    %c20 = arith.constant 20 : index
    %c0_14 = arith.constant 0 : index
    %30 = vector.load %arg2[%c20, %c0_14] : memref<36x128xf32, #tpu.memory_space<vmem>>, vector<4x128xf32>
    %cst_15 = arith.constant dense<0.000000e+00> : vector<64x128xf32>
    %31 = tpu.matmul %29, %30, %cst_15 {dimension_numbers = #tpu.dot_dimension_numbers<[1], [0], [0], [1], [0, 0, 1, 1], [], []>} : vector<64x4xf32>, vector<4x128xf32>, vector<64x128xf32> -> vector<64x128xf32>
    %32 = arith.addf %27, %31 : vector<64x128xf32>
    %33 = vector.extract_strided_slice %1 {offsets = [2, 0, 0], sizes = [8, 8, 4], strides = [1, 1, 1]} : vector<10x10x4xf32> to vector<8x8x4xf32>
    %34 = vector.shape_cast %33 : vector<8x8x4xf32> to vector<64x4xf32>
    %c24 = arith.constant 24 : index
    %c0_16 = arith.constant 0 : index
    %35 = vector.load %arg2[%c24, %c0_16] : memref<36x128xf32, #tpu.memory_space<vmem>>, vector<4x128xf32>
    %cst_17 = arith.constant dense<0.000000e+00> : vector<64x128xf32>
    %36 = tpu.matmul %34, %35, %cst_17 {dimension_numbers = #tpu.dot_dimension_numbers<[1], [0], [0], [1], [0, 0, 1, 1], [], []>} : vector<64x4xf32>, vector<4x128xf32>, vector<64x128xf32> -> vector<64x128xf32>
    %37 = arith.addf %32, %36 : vector<64x128xf32>
    %38 = vector.extract_strided_slice %1 {offsets = [2, 1, 0], sizes = [8, 8, 4], strides = [1, 1, 1]} : vector<10x10x4xf32> to vector<8x8x4xf32>
    %39 = vector.shape_cast %38 : vector<8x8x4xf32> to vector<64x4xf32>
    %c28 = arith.constant 28 : index
    %c0_18 = arith.constant 0 : index
    %40 = vector.load %arg2[%c28, %c0_18] : memref<36x128xf32, #tpu.memory_space<vmem>>, vector<4x128xf32>
    %cst_19 = arith.constant dense<0.000000e+00> : vector<64x128xf32>
    %41 = tpu.matmul %39, %40, %cst_19 {dimension_numbers = #tpu.dot_dimension_numbers<[1], [0], [0], [1], [0, 0, 1, 1], [], []>} : vector<64x4xf32>, vector<4x128xf32>, vector<64x128xf32> -> vector<64x128xf32>
    %42 = arith.addf %37, %41 : vector<64x128xf32>
    %43 = vector.extract_strided_slice %1 {offsets = [2, 2, 0], sizes = [8, 8, 4], strides = [1, 1, 1]} : vector<10x10x4xf32> to vector<8x8x4xf32>
    %44 = vector.shape_cast %43 : vector<8x8x4xf32> to vector<64x4xf32>
    %c32 = arith.constant 32 : index
    %c0_20 = arith.constant 0 : index
    %45 = vector.load %arg2[%c32, %c0_20] : memref<36x128xf32, #tpu.memory_space<vmem>>, vector<4x128xf32>
    %cst_21 = arith.constant dense<0.000000e+00> : vector<64x128xf32>
    %46 = tpu.matmul %44, %45, %cst_21 {dimension_numbers = #tpu.dot_dimension_numbers<[1], [0], [0], [1], [0, 0, 1, 1], [], []>} : vector<64x4xf32>, vector<4x128xf32>, vector<64x128xf32> -> vector<64x128xf32>
    %47 = arith.addf %42, %46 : vector<64x128xf32>
    %c0_22 = arith.constant 0 : index
    %c0_23 = arith.constant 0 : index
    %48 = vector.load %arg3[%c0_22, %c0_23] : memref<1x128xf32, #tpu.memory_space<vmem>>, vector<1x128xf32>
    %49 = vector.broadcast %48 : vector<1x128xf32> to vector<64x128xf32>
    %50 = arith.addf %47, %49 : vector<64x128xf32>
    %cst_24 = arith.constant 0.000000e+00 : f32
    %51 = vector.broadcast %cst_24 : f32 to vector<64x128xf32>
    %52 = arith.maximumf %50, %51 : vector<64x128xf32>
    %53 = vector.shape_cast %52 : vector<64x128xf32> to vector<8x8x128xf32>
    %cst_25 = arith.constant 0.000000e+00 : f32
    %54 = vector.broadcast %cst_25 : f32 to vector<1x10x10x128xf32>
    %c0_26 = arith.constant 0 : index
    %c0_27 = arith.constant 0 : index
    %c0_28 = arith.constant 0 : index
    %c0_29 = arith.constant 0 : index
    %55 = vector.load %arg4[%c0_26, %c0_27, %c0_28, %c0_29] : memref<1x10x10x128xf32, #tpu.memory_space<vmem>>, vector<1x10x10x128xf32>
    tpu.vector_store %arg4[%c0_26, %c0_27, %c0_28, %c0_29], %54 {strides = array<i32>} : memref<1x10x10x128xf32, #tpu.memory_space<vmem>>, vector<1x10x10x128xf32>,
    %c0_30 = arith.constant 0 : index
    %c1 = arith.constant 1 : index
    %c1_31 = arith.constant 1 : index
    %c0_32 = arith.constant 0 : index
    %56 = vector.load %arg4[%c0_30, %c1, %c1_31, %c0_32] : memref<1x10x10x128xf32, #tpu.memory_space<vmem>>, vector<1x8x8x128xf32>
    %57 = vector.shape_cast %56 : vector<1x8x8x128xf32> to vector<8x8x128xf32>
    %58 = vector.shape_cast %53 : vector<8x8x128xf32> to vector<1x8x8x128xf32>
    tpu.vector_store %arg4[%c0_30, %c1, %c1_31, %c0_32], %58 {strides = array<i32>} : memref<1x10x10x128xf32, #tpu.memory_space<vmem>>, vector<1x8x8x128xf32>,
    return
  }
  func.func @transform_0(%arg0: i32) -> (i32, i32, i32, i32) {
    %c0_i32 = arith.constant 0 : i32
    %c0_i32_0 = arith.constant 0 : i32
    %c0_i32_1 = arith.constant 0 : i32
    %c0_i32_2 = arith.constant 0 : i32
    return %arg0, %c0_i32, %c0_i32_0, %c0_i32_1 : i32, i32, i32, i32
  }
  func.func @transform_1(%arg0: i32) -> (i32, i32) {
    %c0_i32 = arith.constant 0 : i32
    %c0_i32_0 = arith.constant 0 : i32
    %c0_i32_1 = arith.constant 0 : i32
    return %c0_i32, %c0_i32_0 : i32, i32
  }
  func.func @transform_2(%arg0: i32) -> (i32, i32) {
    %c0_i32 = arith.constant 0 : i32
    %c0_i32_0 = arith.constant 0 : i32
    %c0_i32_1 = arith.constant 0 : i32
    return %c0_i32, %c0_i32_0 : i32, i32
  }
  func.func @transform_3(%arg0: i32) -> (i32, i32, i32, i32) {
    %c0_i32 = arith.constant 0 : i32
    %c0_i32_0 = arith.constant 0 : i32
    %c0_i32_1 = arith.constant 0 : i32
    %c0_i32_2 = arith.constant 0 : i32
    return %arg0, %c0_i32, %c0_i32_0, %c0_i32_1 : i32, i32, i32, i32
  }
}

</mosaic_0001>

<bundles_post_ra>
// kernel: tpu_custom_call.1
= control target key start
LH: loop header
LB: loop body
LE: loop exit
PB: predicated region body
PF: predicated region fallthrough
CT: control target
= control target key end

     0   :  { %s1890_s12 = smov 0   ;;  %s2253_s0 = inlined_call_operand.vmem [shape: f32[2,10,10,4], index: 0, kind: input, shape index: {}]   ;;  %s2254_s1 = inlined_call_operand.vmem [shape: f32[36,128], index: 1, kind: input, shape index: {}]   ;;  %s2255_s2 = inlined_call_operand.vmem [shape: f32[1,128], index: 2, kind: input, shape index: {}]   ;;  %s2256_s3 = inlined_call_operand.vmem [shape: f32[2,10,10,128], index: 3, kind: output, shape index: {}]  }
   0x1 LB: > { %s1479_s13 = sadd.s32 4294967295, %s1867_s12   ;;  %p1483_p0 = scmp.ge.s32.totalorder %s1867_s12, 1  ;;  %s1867_s12 = sphi %s1890_s12, %s13_s12  }
   0x2   : > { %p137_p1 = scmp.lt.s32.totalorder %s1867_s12, 3 }
   0x4   : > { %p138_p2 = pnand %p1483_p0, %p137_p1 }
   0x5   : > { %v233_v0 = vld [vmem:[%s2254_s1 + $0x4] sm:$0xf] (!%p138_p2)  ;;  %vm251_vm0 = vcmask (!%p138_p2), 1043456   ;;  %v1904_v1 = vld [vmem:[%s2254_s1 + $0x10] sm:$0xf] (!%p138_p2)  ;;  %p161_p3 = scmp.lt.s32.totalorder (!%p138_p2), %s1479_s13, 1 }
   0x6   : > { %141 = sbr.rel (%p138_p2) target bundleno = 311 (0x137), region = 32  ;;  %1659 = vmatprep.subr.msk.mxu1 (!%p138_p2), %vm251_vm0, %v233_v0  ;;  %1715 = vmatprep.subr.msk.mxu0 (!%p138_p2), %vm251_vm0, %v1904_v1  ;;  %v191_v2 = vld [vmem:[%s2254_s1] sm:$0xf] (!%p138_p2)  ;;  %v888_v3 = vld [vmem:[%s2254_s1 + $0x14] sm:$0xf] (!%p138_p2)  ;;  %vm208_vm1 = vcmask (!%p138_p2), 1046528  }
   0x7   : > { %1660 = vmatpush3.msk.msra.mxu1 (!%p138_p2), %vm251_vm0, %v233_v0  ;;  %1716 = vmatpush3.msk.msra.mxu0 (!%p138_p2), %vm251_vm0, %v1904_v1  ;;  %vm234_vm2 = vcmask (!%p138_p2), 31744   ;;  %v1007_v21 = vld [vmem:[%s2254_s1 + $0x18] sm:$0xf] (!%p138_p2)  ;;  %v1970_v28 = vld [vmem:[%s2254_s1 + $0x8] sm:$0xf] (!%p138_p2)  ;;  %vm484_vm3 = vcmask (!%p138_p2), 1045504  }
   0x8   : > { %1673 = vmatprep.subr.msk.mxu1 (!%p138_p2), %vm251_vm0, %v191_v2  ;;  %1729 = vmatprep.subr.msk.mxu0 (!%p138_p2), %vm251_vm0, %v888_v3  ;;  %v1131_v58 = vld [vmem:[%s2254_s1 + $0x1c] sm:$0xf] (!%p138_p2) }
   0xd   : > { %s2258_s13 = smov (!%p161_p3, %s1479_s13), 1 }
   0xe   : > { %s1851_s22 = smul.u32 160, %s2258_s13 }
  0x10   : > { %s1928_s25 = scalar_lea.vmem %s2253_s0, %s1851_s22  ;;  %s2217_s11 = scalar_lea.vmem %s2256_s3, %s1851_s22 }
  0x11   : > { %v1931_v4 = vld [vmem:[%s1928_s25] sm:$0xff]  ;;  %v1934_v5 = vld [vmem:[%s1928_s25 + $0x8] sm:$0x3]  ;;  %v1937_v6 = vld [vmem:[%s1928_s25 + $0x10] sm:$0xff] }
  0x12   : > { %v209_v7 = vrot.slane %v1931_v4, 1  ;;  %v210_v8 = vrot.slane %v1934_v5, 1  ;;  %v174_v9 = vld [vmem:[%s1928_s25 + $0x18] sm:$0x3]  ;;  %v212_v10 = vrot.slane %v1937_v6, 1  ;;  %v1944_v12 = vld [vmem:[%s1928_s25 + $0x20] sm:$0xff] }
  0x13   : > { %v213_v11 = vrot.slane %v174_v9, 1  ;;  %v176_v13 = vld [vmem:[%s1928_s25 + $0x28] sm:$0x3]  ;;  %v1948_v14 = vld [vmem:[%s1928_s25 + $0x30] sm:$0xff]  ;;  %v489_v16 = vrot.slane %v174_v9, 2  ;;  %v215_v17 = vrot.slane %v1944_v12, 1 }
  0x14   : > { %v211_v15 = vsel %vm208_vm1, %v209_v7, %v210_v8  ;;  %v216_v18 = vrot.slane %v176_v13, 1  ;;  %v178_v19 = vld [vmem:[%s1928_s25 + $0x38] sm:$0x3]  ;;  %v1954_v20 = vld [vmem:[%s1928_s25 + $0x40] sm:$0xff]  ;;  %v218_v23 = vrot.slane %v1948_v14, 1  ;;  %v1965_v27 = vld [vmem:[%s1928_s25 + $0x50] sm:$0xff] }
  0x15   : > { %1661 = vmatprep.mubr.msk.f32.mxu1 %vm234_vm2, %v211_v15  ;;  %v214_v22 = vsel %vm208_vm1, %v212_v10, %v213_v11  ;;  %v219_v24 = vrot.slane %v178_v19, 1  ;;  %v180_v25 = vld [vmem:[%s1928_s25 + $0x48] sm:$0x3]  ;;  %v221_v26 = vrot.slane %v1954_v20, 1  ;;  %v488_v31 = vrot.slane %v1937_v6, 2  ;;  %v1980_v33 = vld [vmem:[%s1928_s25 + $0x60] sm:$0xff] }
  0x16   : > { %1717 = vmatprep.mubr.msk.f32.mxu0 %vm234_vm2, %v214_v22  ;;  %1662 = vmatmul.mubr.msk.f32.vlgmr.msra.gmra.mrb[0].mxu1 %vm234_vm2, %v214_v22  ;;  %v1975_v29 = vsel %vm208_vm1, %v215_v17, %v216_v18  ;;  %v222_v30 = vrot.slane %v180_v25, 1  ;;  %v182_v32 = vld [vmem:[%s1928_s25 + $0x58] sm:$0x3]  ;;  %v492_v34 = vrot.slane %v176_v13, 2  ;;  %v224_v36 = vrot.slane %v1965_v27, 1  ;;  %v1999_v43 = vld [vmem:[%s1928_s25 + $0x70] sm:$0xff] }
  0x17   : > { %1674 = vmatpush3.msk.msra.mxu1 %vm251_vm0, %v191_v2  ;;  %1718 = vmatmul.mubr.msk.f32.vlgmr.msra.gmra.mrb[0].mxu0 %vm234_vm2, %v1975_v29  ;;  %v1986_v35 = vsel %vm208_vm1, %v218_v23, %v219_v24  ;;  %v225_v37 = vrot.slane %v182_v32, 1  ;;  %v184_v38 = vld [vmem:[%s1928_s25 + $0x68] sm:$0x3]  ;;  %v491_v40 = vrot.slane %v1944_v12, 2  ;;  %v227_v41 = vrot.slane %v1980_v33, 1 }
  0x18   : > { %1730 = vmatpush3.msk.msra.mxu0 %vm251_vm0, %v888_v3  ;;  %1664 = vmatprep.mubr.msk.f32.mxu1 %vm234_vm2, %v1975_v29  ;;  %v1994_v39 = vsel %vm208_vm1, %v221_v26, %v222_v30  ;;  %v228_v42 = vrot.slane %v184_v38, 1  ;;  %v186_v44 = vld [vmem:[%s1928_s25 + $0x78] sm:$0x3]  ;;  %v2005_v45 = vsel %vm484_vm3, %v488_v31, %v489_v16  ;;  %v494_v46 = vrot.slane %v1948_v14, 2  ;;  %v2058_v3 = vld [vmem:[%s1928_s25 + $0x80] sm:$0xff] }
  0x19   : > { %1720 = vmatprep.mubr.msk.f32.mxu0 %vm234_vm2, %v1986_v35  ;;  %1743 = vmatprep.subr.msk.mxu0 %vm251_vm0, %v1007_v21  ;;  %v495_v47 = vrot.slane %v178_v19, 2  ;;  %v2018_v48 = vsel %vm208_vm1, %v224_v36, %v225_v37  ;;  %v230_v49 = vrot.slane %v1999_v43, 1  ;;  %v231_v50 = vrot.slane %v186_v44, 1  ;;  %v2061_v7 = vld [vmem:[%s1928_s25 + $0x88] sm:$0x3] }
  0x1a   : > { %1665 = vmatmul.mubr.msk.f32.gmra.mrb[2].mxu1 %vm234_vm2, %v1986_v35  ;;  %1687 = vmatprep.subr.msk.mxu1 %vm251_vm0, %v1970_v28  ;;  %v2024_v51 = vsel %vm484_vm3, %v491_v40, %v492_v34  ;;  %v2027_v52 = vsel %vm208_vm1, %v227_v41, %v228_v42  ;;  %v497_v53 = vrot.slane %v1954_v20, 2  ;;  %v498_v54 = vrot.slane %v180_v25, 2  ;;  %v642_v13 = vld [vmem:[%s2254_s1 + $0xc] sm:$0xf]  ;;  %v1253_v18 = vld [vmem:[%s2254_s1 + $0x20] sm:$0xf] }
  0x1b   : > { %1721 = vmatmul.mubr.msk.f32.gmra.mrb[2].mxu0 %vm234_vm2, %v1994_v39  ;;  %1667 = vmatprep.mubr.msk.f32.mxu1 %vm234_vm2, %v1994_v39  ;;  %v2031_v55 = vsel %vm484_vm3, %v494_v46, %v495_v47  ;;  %v500_v56 = vrot.slane %v1965_v27, 2  ;;  %v501_v57 = vrot.slane %v182_v32, 2  ;;  %v2044_v59 = vsel %vm208_vm1, %v230_v49, %v231_v50  ;;  %v190_v22 = vld [vmem:[%s1928_s25 + $0x98] sm:$0x3]  ;;  %v1567_v31 = vld [vmem:[%s2255_s2] ss:$0 sm:$0xff] }
  0x1c   : > { %1731 = vmatprep.mubr.msk.f32.mxu0 %vm234_vm2, %v2005_v45  ;;  %v2050_v60 = vsel %vm484_vm3, %v497_v53, %v498_v54  ;;  %v503_v61 = vrot.slane %v1980_v33, 2  ;;  %v504_v62 = vrot.slane %v184_v38, 2  ;;  %v506_v0 = vrot.slane %v1999_v43, 2 }
  0x1d   : > { %v2054_v63 = vsel %vm484_vm3, %v500_v56, %v501_v57  ;;  %v507_v2 = vrot.slane %v186_v44, 2  ;;  %v885_v9 = vrot.slane %v2058_v3, 2  ;;  %v886_v10 = vrot.slane %v2061_v7, 2 }
  0x1e   : > { %1668 = vmatmul.mubr.msk.f32.gmra.mrb[4].mxu1 %vm234_vm2, %v2018_v48  ;;  %v2073_v8 = vsel %vm484_vm3, %v503_v61, %v504_v62  ;;  %v486_v16 = vrot.slane %v1934_v5, 2  ;;  %v485_v17 = vrot.slane %v1931_v4, 2  ;;  %v189_v5 = vld [vmem:[%s1928_s25 + $0x90] sm:$0xff]  ;;  %v763_v19 = vrot.slane %v2058_v3, 1 }
  0x1f   : > { %1732 = vmatmul.mubr.msk.f32.vlgmr.msra.gmra.mrb[0].mxu0 %vm234_vm2, %v2024_v51  ;;  %1670 = vmatprep.mubr.msk.f32.mxu1 %vm234_vm2, %v2027_v52  ;;  %v2078_v11 = vsel %vm484_vm3, %v506_v0, %v507_v2  ;;  %v2094_v15 = vsel %vm484_vm3, %v885_v9, %v886_v10  ;;  %v1128_v23 = vrot.slane %v189_v5, 1  ;;  %v1129_v24 = vrot.slane %v190_v22, 1 }
  0x20   : > { %1744 = vmatpush3.msk.msra.mxu0 %vm251_vm0, %v1007_v21  ;;  %1734 = vmatprep.mubr.msk.f32.mxu0 %vm234_vm2, %v2031_v55  ;;  %v764_v21 = vrot.slane %v2061_v7, 1 }
  0x21   : > { %1757 = vmatprep.subr.msk.mxu0 %vm251_vm0, %v1131_v58 }
  0x22   : > { %1671 = vmatmul.mubr.msk.f32.gmra.mrb[6].mxu1 %vm234_vm2, %v2044_v59  ;;  %v765_v25 = vsel %vm208_vm1, %v763_v19, %v764_v21 }
  0x23   : > { %1735 = vmatmul.mubr.msk.f32.gmra.mrb[2].mxu0 %vm234_vm2, %v2050_v60  ;;  %1675 = vmatprep.mubr.msk.f32.mxu1 %vm234_vm2, %v1931_v4  ;;  %v487_v4 = vsel %vm484_vm3, %v485_v17, %v486_v16 }
  0x24   : > { %1737 = vmatprep.mubr.msk.f32.mxu0 %vm234_vm2, %v2054_v63 }
  0x26   : > { %1676 = vmatmul.mubr.msk.f32.vlgmr.msra.gmra.mrb[0].mxu1 %vm234_vm2, %v1937_v6 }
  0x27   : > { %1688 = vmatpush3.msk.msra.mxu1 %vm251_vm0, %v1970_v28  ;;  %1738 = vmatmul.mubr.msk.f32.gmra.mrb[4].mxu0 %vm234_vm2, %v2073_v8 }
  0x28   : > { %1678 = vmatprep.mubr.msk.f32.mxu1 %vm234_vm2, %v1944_v12  ;;  %1740 = vmatprep.mubr.msk.f32.mxu0 %vm234_vm2, %v2078_v11 }
  0x29   : > { %1701 = vmatprep.subr.msk.mxu1 %vm251_vm0, %v642_v13 }
  0x2a   : > { %1679 = vmatmul.mubr.msk.f32.gmra.mrb[2].mxu1 %vm234_vm2, %v1948_v14 }
  0x2b   : > { %1741 = vmatmul.mubr.msk.f32.gmra.mrb[6].mxu0 %vm234_vm2, %v2094_v15  ;;  %1681 = vmatprep.mubr.msk.f32.mxu1 %vm234_vm2, %v1954_v20 }
  0x2c   : > { %1745 = vmatprep.mubr.msk.f32.mxu0 %vm234_vm2, %v1944_v12 }
  0x2e   : > { %1682 = vmatmul.mubr.msk.f32.gmra.mrb[4].mxu1 %vm234_vm2, %v1965_v27 }
  0x2f   : > { %1746 = vmatmul.mubr.msk.f32.vlgmr.msra.gmra.mrb[0].mxu0 %vm234_vm2, %v1948_v14  ;;  %1684 = vmatprep.mubr.msk.f32.mxu1 %vm234_vm2, %v1980_v33 }
  0x30   : > { %1758 = vmatpush3.msk.msra.mxu0 %vm251_vm0, %v1131_v58  ;;  %1748 = vmatprep.mubr.msk.f32.mxu0 %vm234_vm2, %v1954_v20 }
  0x31   : > { %1771 = vmatprep.subr.msk.mxu0 %vm251_vm0, %v1253_v18 }
  0x32   : > { %1685 = vmatmul.mubr.msk.f32.gmra.mrb[6].mxu1 %vm234_vm2, %v1999_v43 }
  0x33   : > { %1749 = vmatmul.mubr.msk.f32.gmra.mrb[2].mxu0 %vm234_vm2, %v1965_v27  ;;  %1689 = vmatprep.mubr.msk.f32.mxu1 %vm234_vm2, %v487_v4 }
  0x34   : > { %1751 = vmatprep.mubr.msk.f32.mxu0 %vm234_vm2, %v1980_v33 }
  0x36   : > { %1690 = vmatmul.mubr.msk.f32.vlgmr.msra.gmra.mrb[0].mxu1 %vm234_vm2, %v2005_v45 }
  0x37   : > { %1702 = vmatpush3.msk.msra.mxu1 %vm251_vm0, %v642_v13  ;;  %1752 = vmatmul.mubr.msk.f32.gmra.mrb[4].mxu0 %vm234_vm2, %v1999_v43 }
  0x38   : > { %1692 = vmatprep.mubr.msk.f32.mxu1 %vm234_vm2, %v2024_v51  ;;  %1754 = vmatprep.mubr.msk.f32.mxu0 %vm234_vm2, %v2058_v3 }
  0x39   : > { %1785 = vmatprep.subr.msk.mxu1 %vm251_vm0, %v1904_v1 }
  0x3a   : > { %1693 = vmatmul.mubr.msk.f32.gmra.mrb[2].mxu1 %vm234_vm2, %v2031_v55 }
  0x3b   : > { %1755 = vmatmul.mubr.msk.f32.gmra.mrb[6].mxu0 %vm234_vm2, %v189_v5  ;;  %1695 = vmatprep.mubr.msk.f32.mxu1 %vm234_vm2, %v2050_v60 }
  0x3c   : > { %1759 = vmatprep.mubr.msk.f32.mxu0 %vm234_vm2, %v1975_v29 }
  0x3e   : > { %1696 = vmatmul.mubr.msk.f32.gmra.mrb[4].mxu1 %vm234_vm2, %v2054_v63 }
  0x3f   : > { %1760 = vmatmul.mubr.msk.f32.vlgmr.msra.gmra.mrb[0].mxu0 %vm234_vm2, %v1986_v35  ;;  %1698 = vmatprep.mubr.msk.f32.mxu1 %vm234_vm2, %v2073_v8 }
  0x40   : > { %1772 = vmatpush3.msk.msra.mxu0 %vm251_vm0, %v1253_v18  ;;  %1762 = vmatprep.mubr.msk.f32.mxu0 %vm234_vm2, %v1994_v39 }
  0x42   : > { %1699 = vmatmul.mubr.msk.f32.gmra.mrb[6].mxu1 %vm234_vm2, %v2078_v11 }
  0x43   : > { %1763 = vmatmul.mubr.msk.f32.gmra.mrb[2].mxu0 %vm234_vm2, %v2018_v48  ;;  %1703 = vmatprep.mubr.msk.f32.mxu1 %vm234_vm2, %v1937_v6  ;;  %v1130_v6 = vsel %vm208_vm1, %v1128_v23, %v1129_v24 }
  0x44   : > { %1765 = vmatprep.mubr.msk.f32.mxu0 %vm234_vm2, %v2027_v52 }
  0x46   : > { %1704 = vmatmul.mubr.msk.f32.vlgmr.msra.gmra.mrb[0].mxu1 %vm234_vm2, %v1944_v12  ;;  %v1251_v12 = vrot.slane %v190_v22, 2 }
  0x47   : > { %1786 = vmatpush3.msk.msra.mxu1 %vm251_vm0, %v1904_v1  ;;  %1766 = vmatmul.mubr.msk.f32.gmra.mrb[4].mxu0 %vm234_vm2, %v2044_v59  ;;  %v1250_v1 = vrot.slane %v189_v5, 2 }
  0x48   : > { %1706 = vmatprep.mubr.msk.f32.mxu1 %vm234_vm2, %v1948_v14  ;;  %1768 = vmatprep.mubr.msk.f32.mxu0 %vm234_vm2, %v765_v25 }
  0x49   : > { %v1252_v14 = vsel %vm484_vm3, %v1250_v1, %v1251_v12 }
  0x4a   : > { %1707 = vmatmul.mubr.msk.f32.gmra.mrb[2].mxu1 %vm234_vm2, %v1954_v20  ;;  %v1869_v20 = vmov 0.0  }
  0x4b   : > { %1769 = vmatmul.mubr.msk.f32.gmra.mrb[6].mxu0 %vm234_vm2, %v1130_v6  ;;  %1709 = vmatprep.mubr.msk.f32.mxu1 %vm234_vm2, %v1965_v27  ;;  %1395 = vst [vmem:[%s2217_s11] sm:$0xff] %v1869_v20  ;;  %1396 = vst [vmem:[%s2217_s11 + $0x8] sm:$0x3] %v1869_v20 }
  0x4c   : > { %1773 = vmatprep.mubr.msk.f32.mxu0 %vm234_vm2, %v2024_v51  ;;  %1399 = vst [vmem:[%s2217_s11 + $0x20] sm:$0xff] %v1869_v20  ;;  %1400 = vst [vmem:[%s2217_s11 + $0x28] sm:$0x3] %v1869_v20 }
  0x4d   : > { %1413 = vst [vmem:[%s2217_s11 + $0x90] sm:$0xff] %v1869_v20  ;;  %1414 = vst [vmem:[%s2217_s11 + $0x98] sm:$0x3] %v1869_v20 }
  0x4e   : > { %1710 = vmatmul.mubr.msk.f32.gmra.mrb[4].mxu1 %vm234_vm2, %v1980_v33  ;;  %1397 = vst [vmem:[%s2217_s11 + $0x10] sm:$0xff] %v1869_v20  ;;  %1398 = vst [vmem:[%s2217_s11 + $0x18] sm:$0x3] %v1869_v20 }
  0x4f   : > { %1774 = vmatmul.mubr.msk.f32.vlgmr.msra.gmra.mrb[0].mxu0 %vm234_vm2, %v2031_v55  ;;  %1712 = vmatprep.mubr.msk.f32.mxu1 %vm234_vm2, %v1999_v43  ;;  %1401 = vst [vmem:[%s2217_s11 + $0x30] sm:$0xff] %v1869_v20  ;;  %1402 = vst [vmem:[%s2217_s11 + $0x38] sm:$0x3] %v1869_v20 }
  0x50   : > { %1776 = vmatprep.mubr.msk.f32.mxu0 %vm234_vm2, %v2050_v60  ;;  %1403 = vst [vmem:[%s2217_s11 + $0x40] sm:$0xff] %v1869_v20  ;;  %1404 = vst [vmem:[%s2217_s11 + $0x48] sm:$0x3] %v1869_v20 }
  0x51   : > { %1405 = vst [vmem:[%s2217_s11 + $0x50] sm:$0xff] %v1869_v20  ;;  %1406 = vst [vmem:[%s2217_s11 + $0x58] sm:$0x3] %v1869_v20 }
  0x52   : > { %1713 = vmatmul.mubr.msk.f32.gmra.mrb[6].mxu1 %vm234_vm2, %v2058_v3  ;;  %1407 = vst [vmem:[%s2217_s11 + $0x60] sm:$0xff] %v1869_v20  ;;  %1408 = vst [vmem:[%s2217_s11 + $0x68] sm:$0x3] %v1869_v20 }
  0x53   : > { %1777 = vmatmul.mubr.msk.f32.gmra.mrb[2].mxu0 %vm234_vm2, %v2054_v63  ;;  %1723 = vmatprep.mubr.msk.f32.mxu1 %vm234_vm2, %v2018_v48  ;;  %1409 = vst [vmem:[%s2217_s11 + $0x70] sm:$0xff] %v1869_v20  ;;  %1410 = vst [vmem:[%s2217_s11 + $0x78] sm:$0x3] %v1869_v20 }
  0x54   : > { %1779 = vmatprep.mubr.msk.f32.mxu0 %vm234_vm2, %v2073_v8  ;;  %1411 = vst [vmem:[%s2217_s11 + $0x80] sm:$0xff] %v1869_v20  ;;  %1412 = vst [vmem:[%s2217_s11 + $0x88] sm:$0x3] %v1869_v20 }
  0x56   : > { %1724 = vmatmul.mubr.msk.f32.vlgmr.msra.gmra.mrb[4].mxu1 %vm234_vm2, %v2027_v52 }
  0x57   : > { %1780 = vmatmul.mubr.msk.f32.gmra.mrb[4].mxu0 %vm234_vm2, %v2078_v11  ;;  %1726 = vmatprep.mubr.msk.f32.mxu1 %vm234_vm2, %v2044_v59 }
  0x58   : > { %1782 = vmatprep.mubr.msk.f32.mxu0 %vm234_vm2, %v2094_v15 }
  0x5a   : > { %1727 = vmatmul.mubr.msk.f32.gmra.mrb[6].mxu1 %vm234_vm2, %v765_v25 }
  0x5b   : > { %1783 = vmatmul.mubr.msk.f32.gmra.mrb[6].mxu0 %vm234_vm2, %v1252_v14 }
 0x119   : > { %v1705_v26 = vpop.f32.mrb[0].mxu1 }
 0x11a   : > { %v715_v27 = vpop.f32.mrb[1].mxu1 }
 0x11d   : > { %v1708_v28 = vpop.f32.mrb[2].mxu1 }
 0x11e   : > { %v725_v29 = vpop.f32.mrb[3].mxu1 }
 0x122   : > { %v1775_v30 = vpop.f32.mrb[0].mxu0 }
 0x123   : > { %v1787_v32 = vadd.f32 %v1775_v30, %v1705_v26  ;;  %v1325_v33 = vpop.f32.mrb[1].mxu0 }
 0x124   : > { %v1788_v34 = vadd.f32 %v1325_v33, %v715_v27 }
 0x125   : > { %v1380_v35 = vadd.f32 %v1787_v32, %v1567_v31 }
 0x126   : > { %v1379_v36 = vadd.f32 %v1788_v34, %v1567_v31  ;;  %v1778_v37 = vpop.f32.mrb[2].mxu0 }
 0x127   : > { %v1388_v38 = vmax.f32 %v1380_v35, 0.0  ;;  %v1789_v39 = vadd.f32 %v1778_v37, %v1708_v28  ;;  %v1335_v40 = vpop.f32.mrb[3].mxu0 }
 0x128   : > { %v1387_v41 = vmax.f32 %v1379_v36, 0.0  ;;  %v1790_v42 = vadd.f32 %v1335_v40, %v725_v29 }
 0x129   : > { %1569 = vst [vmem:[%s2217_s11 + $0x21] sm:$0xff] %v1388_v38  ;;  %v1382_v43 = vadd.f32 %v1789_v39, %v1567_v31  ;;  %v1725_v44 = vpop.f32.mrb[4].mxu1 }
 0x12a   : > { %1568 = vst [vmem:[%s2217_s11 + $0x11] sm:$0xff] %v1387_v41  ;;  %v1381_v45 = vadd.f32 %v1790_v42, %v1567_v31  ;;  %v1781_v46 = vpop.f32.mrb[4].mxu0  ;;  %v858_v47 = vpop.f32.mrb[5].mxu1 }
 0x12b   : > { %v1390_v48 = vmax.f32 %v1382_v43, 0.0  ;;  %v1791_v49 = vadd.f32 %v1781_v46, %v1725_v44  ;;  %v1345_v50 = vpop.f32.mrb[5].mxu0 }
 0x12c   : > { %v1389_v51 = vmax.f32 %v1381_v45, 0.0  ;;  %v1792_v52 = vadd.f32 %v1345_v50, %v858_v47 }
 0x12d   : > { %1571 = vst [vmem:[%s2217_s11 + $0x41] sm:$0xff] %v1390_v48  ;;  %v1384_v53 = vadd.f32 %v1791_v49, %v1567_v31  ;;  %v1728_v54 = vpop.f32.mrb[6].mxu1 }
 0x12e   : > { %1570 = vst [vmem:[%s2217_s11 + $0x31] sm:$0xff] %v1389_v51  ;;  %v1383_v55 = vadd.f32 %v1792_v52, %v1567_v31  ;;  %v1784_v56 = vpop.f32.mrb[6].mxu0  ;;  %v868_v57 = vpop.f32.mrb[7].mxu1 }
 0x12f   : > { %v1392_v58 = vmax.f32 %v1384_v53, 0.0  ;;  %v1793_v59 = vadd.f32 %v1784_v56, %v1728_v54  ;;  %v1355_v60 = vpop.f32.mrb[7].mxu0 }
 0x130   : > { %v1391_v61 = vmax.f32 %v1383_v55, 0.0  ;;  %v1794_v62 = vadd.f32 %v1355_v60, %v868_v57 }
 0x131   : > { %1573 = vst [vmem:[%s2217_s11 + $0x61] sm:$0xff] %v1392_v58  ;;  %v1386_v63 = vadd.f32 %v1793_v59, %v1567_v31 }
 0x132   : > { %1572 = vst [vmem:[%s2217_s11 + $0x51] sm:$0xff] %v1391_v61  ;;  %v1385_v0 = vadd.f32 %v1794_v62, %v1567_v31 }
 0x133   : > { %v1394_v2 = vmax.f32 %v1386_v63, 0.0 }
 0x134   : > { %v1393_v3 = vmax.f32 %v1385_v0, 0.0 }
 0x135   : > { %1575 = vst [vmem:[%s2217_s11 + $0x81] sm:$0xff] %v1394_v2 }
 0x136   : > { %1574 = vst [vmem:[%s2217_s11 + $0x71] sm:$0xff] %v1393_v3 }
 0x137 PF: > { %s13_s12 = sadd.s32 1, %s1867_s12  }
 0x138   : > { %p10_p4 = scmp.ge.s32.totalorder %s13_s12, 4  }
 0x13a   :  { %12 = sbr.rel (!%p10_p4) target bundleno = 1 (0x1), region = 63 }

</bundles_post_ra>
